<compile_context>
chip_gen: v6e
topology: v6e:2x2x1
jax: 0.10.0
libtpu: 0.0.40
codegen_flags: <defaults>
</compile_context>

<pallas_src>
import jax
import jax.numpy as jnp
from jax.experimental import pallas as pl
from jax.experimental.pallas import tpu as pltpu


def object_model_kernel(h_ref, gamma_ref, beta_ref, mask_ref, w_ref, b_ref,
                        out_ref):
    # h_ref block: (1, tS, E) stream dtype; gamma/beta: (1, 1, E) f32;
    # mask: (1, tS, 1); w_ref: (E, Cp) stream dtype; b_ref: (1, Cp) f32;
    # out_ref: (1, tS, Cp) stream dtype.
    h = h_ref[0].astype(jnp.float32)                              # (tS, E)

    # Single-pass conditional layer norm statistics (torch.std_mean,
    # unbiased=False, no eps): var = E[x^2] - mean^2, clamped >= 0.
    mean = jnp.mean(h, axis=-1, keepdims=True)                    # (tS, 1)
    msq = jnp.mean(h * h, axis=-1, keepdims=True)                 # (tS, 1)
    var = jnp.maximum(msq - mean * mean, 0.0)
    inv_std = jax.lax.rsqrt(var)                                  # EUP, not VALU div

    normed = (h - mean) * inv_std * gamma_ref[0] + beta_ref[0]    # (tS, E) f32

    # One fused, lane-dense classifier matmul on the MXU.  Weights may be bf16
    # (half the DMA, 2x MXU rate on v5e/v6e/v7x); accumulation stays f32.
    logits = jnp.dot(normed.astype(w_ref.dtype), w_ref[...],
                     preferred_element_type=jnp.float32) + b_ref[...]   # (tS, Cp)

    # Mask applied BEFORE sigmoid (matches torch).  Mask is a (tS, 1)
    # sublane-major tile: negligible traffic, no in-kernel relayout.
    m = mask_ref[0].astype(jnp.float32)                           # (tS, 1)
    out_ref[0] = jax.nn.sigmoid(logits * m).astype(out_ref.dtype)


def make_params(key, word_emb_size, num_classes):
    E, C = word_emb_size, num_classes
    H = E // 2
    ks = jax.random.split(key, 12)
    s = 0.1
    p = {
        # gamma encoder: Linear(2E->H), ReLU, Linear(H->E)
        "g_w0": jax.random.normal(ks[0], (2 * E, H), jnp.float32) * s,
        "g_b0": jax.random.normal(ks[1], (H,), jnp.float32) * s,
        "g_w1": jax.random.normal(ks[2], (H, E), jnp.float32) * s,
        "g_b1": jax.random.normal(ks[3], (E,), jnp.float32) * s,
        # beta encoder: Linear(2E->H), ReLU, Linear(H->E)
        "b_w0": jax.random.normal(ks[4], (2 * E, H), jnp.float32) * s,
        "b_b0": jax.random.normal(ks[5], (H,), jnp.float32) * s,
        "b_w1": jax.random.normal(ks[6], (H, E), jnp.float32) * s,
        "b_b1": jax.random.normal(ks[7], (E,), jnp.float32) * s,
        # fc_ps1 / fc_ps2: Linear(E -> C)
        "w_ps1": jax.random.normal(ks[8], (E, C), jnp.float32) * s,
        "b_ps1": jax.random.normal(ks[9], (C,), jnp.float32) * s,
        "w_ps2": jax.random.normal(ks[10], (E, C), jnp.float32) * s,
        "b_ps2": jax.random.normal(ks[11], (C,), jnp.float32) * s,
    }
    # NOTE: nn.LayerNorm's affine params are declared in the torch module but
    # never used in CondLayerNorm.forward, so they are intentionally omitted.
    return p


def _mlp(x, w0, b0, w1, b1):
    return jax.nn.relu(x @ w0 + b0) @ w1 + b1


def _vmem_budget_bytes():
    """Generation-aware VMEM budget: ~75% of physical capacity.
    v7x (64 MiB/TC) -> ~48 MiB; v5e/v6e (128 MiB) -> ~96 MiB."""
    try:
        cap = int(pltpu.get_tpu_info().vmem_capacity_bytes)
    except Exception:
        cap = 64 << 20          # conservative fallback (v7x per-core VMEM)
    return max((cap * 3) // 4, 16 << 20)


def _pick_seq_tile(S, E, Cp, h_bytes, w_bytes, o_bytes, budget, min_steps=1):
    """Largest seq tile whose working set fits the VMEM budget.  Prefers tiles
    that divide S (no padding); otherwise S is padded up to a tile multiple.
    min_steps >= 2 keeps both v7x TensorCores busy when B == 1."""
    s8 = ((S + 7) // 8) * 8
    cands = [c for c in (2048, 1024, 768, 512, 384, 256, 128, 64, 32, 16, 8)
             if c <= s8] or [s8]

    def need(ts):
        return (2 * ts * E * h_bytes        # double-buffered hidden input
                + 2 * ts * Cp * o_bytes     # double-buffered output slab
                + E * Cp * w_bytes          # single-buffered resident weights
                + 2 * ts * h_bytes          # mask
                + 4 * (Cp + 4 * E + 64))    # bias, gamma, beta (+ slack)

    fitting = [c for c in cands if need(c) <= budget] or [cands[-1]]
    for c in fitting:                       # prefer: divides S exactly
        if S % c == 0 and S // c >= min_steps:
            return c
    for c in fitting:                       # else: pad S up to a multiple of c
        if -(-S // c) >= min_steps:
            return c
    return fitting[-1]


def object_model_forward(hidden_states, subject_pos, attention_mask, params,
                         compute_dtype=jnp.bfloat16):
    """compute_dtype controls the dominant HBM streams (hidden in, fused
    weights, output).  LN stats, bias add, accumulation and sigmoid stay f32."""
    B, S, E = hidden_states.shape
    C = params["w_ps1"].shape[1]

    # --- glue: seq_gather of subject head/tail embeddings -------------------
    head_emb = jnp.take_along_axis(
        hidden_states, subject_pos[:, 0][:, None, None], axis=1)[:, 0, :]  # (B, E)
    tail_emb = jnp.take_along_axis(
        hidden_states, subject_pos[:, 1][:, None, None], axis=1)[:, 0, :]  # (B, E)
    subj_emb = jnp.concatenate([head_emb, tail_emb], axis=1)               # (B, 2E)

    # --- glue: tiny gamma/beta encoder MLPs on (B, 2E), kept in f32 ---------
    gamma3 = _mlp(subj_emb, params["g_w0"], params["g_b0"],
                  params["g_w1"], params["g_b1"])[:, None, :].astype(jnp.float32)
    beta3 = _mlp(subj_emb, params["b_w0"], params["b_b0"],
                 params["b_w1"], params["b_b1"])[:, None, :].astype(jnp.float32)

    if attention_mask is None:
        attention_mask = jnp.ones((B, S), hidden_states.dtype)

    # --- interleave + lane-pad the two classifiers --------------------------
    # Columns [w1_c0, w2_c0, w1_c1, w2_c1, ...] so the final (B,S,C,2) output
    # is a plain slice+reshape of the kernel output (no extra stack pass).
    two_c = 2 * C
    w_fused = jnp.stack([params["w_ps1"], params["w_ps2"]], axis=2).reshape(E, two_c)
    b_fused = jnp.stack([params["b_ps1"], params["b_ps2"]], axis=1).reshape(two_c)
    Cp = ((two_c + 127) // 128) * 128
    if Cp > 128:
        Cp = ((two_c + 255) // 256) * 256    # full 256-wide MXU tiles on v6e/v7x
    if Cp > two_c:
        w_fused = jnp.pad(w_fused, ((0, 0), (0, Cp - two_c)))
        b_fused = jnp.pad(b_fused, ((0, Cp - two_c),))
    w_fused = w_fused.astype(compute_dtype)            # bf16: half DMA, 2x MXU
    b_fused = b_fused.astype(jnp.float32)[None, :]     # bias stays f32

    # --- dominant streams in compute_dtype -----------------------------------
    # TODO(synk): ideally the upstream encoder already emits bf16 hidden states;
    # here we cast at the pallas_call boundary.
    h_stream = hidden_states.astype(compute_dtype)
    mask3 = attention_mask.astype(compute_dtype)[:, :, None]               # (B, S, 1)

    h_bytes = jnp.dtype(compute_dtype).itemsize
    budget = int(_vmem_budget_bytes())
    min_steps = 2 if B == 1 else 1          # v7x: keep both TensorCores busy
    ts = _pick_seq_tile(S, E, Cp, h_bytes, h_bytes, h_bytes, budget, min_steps)

    # Pad S up to a tile multiple (padded rows are sliced off below).
    Sp = -(-S // ts) * ts
    if Sp > S:
        h_stream = jnp.pad(h_stream, ((0, 0), (0, Sp - S), (0, 0)))
        mask3 = jnp.pad(mask3, ((0, 0), (0, Sp - S), (0, 0)))

    grid = (B, Sp // ts)

    cost = pl.CostEstimate(
        flops=2 * B * Sp * E * Cp + 8 * B * Sp * E,
        transcendentals=B * Sp * (Cp + 1),
        bytes_accessed=(B * Sp * E * h_bytes        # hidden read
                        + B * Sp * Cp * h_bytes     # output write
                        + E * Cp * h_bytes          # fused weights
                        + B * Sp * h_bytes          # mask
                        + 4 * (Cp + 2 * B * E)),    # bias + gamma/beta (f32)
    )

    def build(single_buffer_weights):
        # Constant index_map -> weights/bias never change across grid steps;
        # Buffered(1) drops their second pipeline buffer (VMEM headroom on v7x).
        wb_mode = ({"pipeline_mode": pl.Buffered(1)}
                   if single_buffer_weights else {})
        return pl.pallas_call(
            object_model_kernel,
            out_shape=jax.ShapeDtypeStruct((B, Sp, Cp), compute_dtype),
            grid_spec=pltpu.PrefetchScalarGridSpec(
                num_scalar_prefetch=0,
                grid=grid,
                in_specs=[
                    pl.BlockSpec((1, ts, E), lambda b, s: (b, s, 0)),   # hidden
                    pl.BlockSpec((1, 1, E), lambda b, s: (b, 0, 0)),    # gamma
                    pl.BlockSpec((1, 1, E), lambda b, s: (b, 0, 0)),    # beta
                    pl.BlockSpec((1, ts, 1), lambda b, s: (b, s, 0)),   # mask
                    pl.BlockSpec((E, Cp), lambda b, s: (0, 0), **wb_mode),
                    pl.BlockSpec((1, Cp), lambda b, s: (0, 0), **wb_mode),
                ],
                out_specs=pl.BlockSpec((1, ts, Cp), lambda b, s: (b, s, 0)),
            ),
            compiler_params=pltpu.CompilerParams(
                dimension_semantics=("parallel", "parallel"),
                vmem_limit_bytes=budget),
            cost_estimate=cost,
        )

    args = (h_stream, gamma3, beta3, mask3, w_fused, b_fused)
    try:
        out_padded = build(True)(*args)
    except Exception:
        # Fallback for Pallas builds without pipeline_mode=Buffered(1) support.
        out_padded = build(False)(*args)

    # Slice off seq/lane padding; interleaved columns make (B,S,C,2) a reshape.
    object_preds = out_padded[:, :S, :two_c].reshape(B, S, C, 2)
    return object_preds


def object_model_reference(hidden_states, subject_pos, attention_mask, params):
    """Pure-JAX f32 reference mirroring the torch forward, for verification."""
    B, S, E = hidden_states.shape
    head_emb = jnp.take_along_axis(
        hidden_states, subject_pos[:, 0][:, None, None], axis=1)[:, 0, :]
    tail_emb = jnp.take_along_axis(
        hidden_states, subject_pos[:, 1][:, None, None], axis=1)[:, 0, :]
    subj_emb = jnp.concatenate([head_emb, tail_emb], axis=1)
    gamma = _mlp(subj_emb, params["g_w0"], params["g_b0"],
                 params["g_w1"], params["g_b1"])[:, None, :]
    beta = _mlp(subj_emb, params["b_w0"], params["b_b0"],
                params["b_w1"], params["b_b1"])[:, None, :]
    mean = jnp.mean(hidden_states, axis=-1, keepdims=True)
    std = jnp.sqrt(jnp.mean((hidden_states - mean) ** 2, axis=-1, keepdims=True))
    h = (hidden_states - mean) / std * gamma + beta
    po1 = h @ params["w_ps1"] + params["b_ps1"]
    po2 = h @ params["w_ps2"] + params["b_ps2"]
    if attention_mask is None:
        attention_mask = jnp.ones((B, S), hidden_states.dtype)
    m = attention_mask[:, :, None]
    po1 = jax.nn.sigmoid(po1 * m)
    po2 = jax.nn.sigmoid(po2 * m)
    return jnp.stack((po1, po2), axis=3)


if __name__ == "__main__":
    B, S, E, C = 2, 8, 32, 4   # batch, sent_len, word_emb_size, num_classes

    key = jax.random.PRNGKey(0)
    k_params, k_h, k_pos = jax.random.split(key, 3)

    params = make_params(k_params, E, C)
    hidden_states = jax.random.normal(k_h, (B, S, E), jnp.float32)
    subject_pos = jax.random.randint(k_pos, (B, 2), 0, S, jnp.int32)
    # attention mask: first batch fully attended, second with trailing padding
    attention_mask = jnp.array(
        [[1.0] * S, [1.0] * (S - 3) + [0.0] * 3], dtype=jnp.float32)

    ref = object_model_reference(hidden_states, subject_pos, attention_mask, params)

    # f32 stream path: tight tolerance.
    out_f32 = jax.block_until_ready(object_model_forward(
        hidden_states, subject_pos, attention_mask, params,
        compute_dtype=jnp.float32))
    assert out_f32.shape == (B, S, C, 2), out_f32.shape
    assert jnp.allclose(out_f32, ref, rtol=1e-5, atol=1e-5), "f32 mismatch"

    # bf16 stream path (production default): loose tolerance.
    out_bf16 = jax.block_until_ready(object_model_forward(
        hidden_states, subject_pos, attention_mask, params,
        compute_dtype=jnp.bfloat16))
    assert out_bf16.shape == (B, S, C, 2), out_bf16.shape
    assert out_bf16.dtype == jnp.bfloat16, out_bf16.dtype
    assert jnp.allclose(out_bf16.astype(jnp.float32), ref,
                        rtol=3e-2, atol=3e-2), "bf16 mismatch"

    print("KERNEL_OK")
</pallas_src>

<mosaic_0001>
module attributes {stable_mosaic.version = 11 : i64} {
  func.func @object_model_kernel(%arg0: i32, %arg1: i32, %arg2: memref<1x8x32xf32, #tpu.memory_space<vmem>>, %arg3: memref<1x1x32xf32, #tpu.memory_space<vmem>>, %arg4: memref<1x1x32xf32, #tpu.memory_space<vmem>>, %arg5: memref<1x8x1xf32, #tpu.memory_space<vmem>>, %arg6: memref<32x128xf32, #tpu.memory_space<vmem>>, %arg7: memref<1x128xf32, #tpu.memory_space<vmem>>, %arg8: memref<1x8x128xf32, #tpu.memory_space<vmem>>) attributes {dimension_semantics = [#tpu.dimension_semantics<parallel>, #tpu.dimension_semantics<parallel>], iteration_bounds = array<i64: 2, 1>, scalar_prefetch = 0 : i64, scratch_operands = 0 : i64, tpu.core_type = #tpu.core_type<tc>, window_params = [{transform_indices = @transform_0, window_bounds = array<i64: 1, 8, 32>}, {transform_indices = @transform_1, window_bounds = array<i64: 1, 1, 32>}, {transform_indices = @transform_2, window_bounds = array<i64: 1, 1, 32>}, {transform_indices = @transform_3, window_bounds = array<i64: 1, 8, 1>}, {pipeline_mode = #tpu.pipeline_mode<synchronous>, transform_indices = @transform_4, window_bounds = array<i64: 32, 128>}, {pipeline_mode = #tpu.pipeline_mode<synchronous>, transform_indices = @transform_5, window_bounds = array<i64: 1, 128>}, {transform_indices = @transform_6, window_bounds = array<i64: 1, 8, 128>}]} {
    %c0 = arith.constant 0 : index
    %c0_0 = arith.constant 0 : index
    %c0_1 = arith.constant 0 : index
    %0 = vector.load %arg2[%c0, %c0_0, %c0_1] : memref<1x8x32xf32, #tpu.memory_space<vmem>>, vector<1x8x32xf32>
    %1 = vector.shape_cast %0 : vector<1x8x32xf32> to vector<8x32xf32>
    %cst = arith.constant dense<0.000000e+00> : vector<8xf32>
    %2 = vector.multi_reduction <add>, %1, %cst [1] : vector<8x32xf32> to vector<8xf32>
    %3 = vector.shape_cast %2 : vector<8xf32> to vector<8x1xf32>
    %cst_2 = arith.constant 3.200000e+01 : f32
    %4 = vector.broadcast %cst_2 : f32 to vector<8x1xf32>
    %5 = arith.divf %3, %4 : vector<8x1xf32>
    %6 = arith.mulf %1, %1 : vector<8x32xf32>
    %cst_3 = arith.constant dense<0.000000e+00> : vector<8xf32>
    %7 = vector.multi_reduction <add>, %6, %cst_3 [1] : vector<8x32xf32> to vector<8xf32>
    %8 = vector.shape_cast %7 : vector<8xf32> to vector<8x1xf32>
    %cst_4 = arith.constant 3.200000e+01 : f32
    %9 = vector.broadcast %cst_4 : f32 to vector<8x1xf32>
    %10 = arith.divf %8, %9 : vector<8x1xf32>
    %11 = arith.mulf %5, %5 : vector<8x1xf32>
    %12 = arith.subf %10, %11 : vector<8x1xf32>
    %cst_5 = arith.constant 0.000000e+00 : f32
    %13 = vector.broadcast %cst_5 : f32 to vector<8x1xf32>
    %14 = arith.maximumf %12, %13 : vector<8x1xf32>
    %15 = math.rsqrt %14 : vector<8x1xf32>
    %16 = vector.broadcast %5 : vector<8x1xf32> to vector<8x32xf32>
    %17 = arith.subf %1, %16 : vector<8x32xf32>
    %18 = vector.broadcast %15 : vector<8x1xf32> to vector<8x32xf32>
    %19 = arith.mulf %17, %18 : vector<8x32xf32>
    %c0_6 = arith.constant 0 : index
    %c0_7 = arith.constant 0 : index
    %c0_8 = arith.constant 0 : index
    %20 = vector.load %arg3[%c0_6, %c0_7, %c0_8] : memref<1x1x32xf32, #tpu.memory_space<vmem>>, vector<1x1x32xf32>
    %21 = vector.shape_cast %20 : vector<1x1x32xf32> to vector<1x32xf32>
    %22 = vector.broadcast %21 : vector<1x32xf32> to vector<8x32xf32>
    %23 = arith.mulf %19, %22 : vector<8x32xf32>
    %c0_9 = arith.constant 0 : index
    %c0_10 = arith.constant 0 : index
    %c0_11 = arith.constant 0 : index
    %24 = vector.load %arg4[%c0_9, %c0_10, %c0_11] : memref<1x1x32xf32, #tpu.memory_space<vmem>>, vector<1x1x32xf32>
    %25 = vector.shape_cast %24 : vector<1x1x32xf32> to vector<1x32xf32>
    %26 = vector.broadcast %25 : vector<1x32xf32> to vector<8x32xf32>
    %27 = arith.addf %23, %26 : vector<8x32xf32>
    %c0_12 = arith.constant 0 : index
    %c0_13 = arith.constant 0 : index
    %28 = vector.load %arg6[%c0_12, %c0_13] : memref<32x128xf32, #tpu.memory_space<vmem>>, vector<32x128xf32>
    %cst_14 = arith.constant dense<0.000000e+00> : vector<8x128xf32>
    %29 = tpu.matmul %27, %28, %cst_14 {dimension_numbers = #tpu.dot_dimension_numbers<[1], [0], [0], [1], [0, 0, 1, 1], [], []>} : vector<8x32xf32>, vector<32x128xf32>, vector<8x128xf32> -> vector<8x128xf32>
    %c0_15 = arith.constant 0 : index
    %c0_16 = arith.constant 0 : index
    %30 = vector.load %arg7[%c0_15, %c0_16] : memref<1x128xf32, #tpu.memory_space<vmem>>, vector<1x128xf32>
    %31 = vector.broadcast %30 : vector<1x128xf32> to vector<8x128xf32>
    %32 = arith.addf %29, %31 : vector<8x128xf32>
    %c0_17 = arith.constant 0 : index
    %c0_18 = arith.constant 0 : index
    %c0_19 = arith.constant 0 : index
    %33 = vector.load %arg5[%c0_17, %c0_18, %c0_19] : memref<1x8x1xf32, #tpu.memory_space<vmem>>, vector<1x8x1xf32>
    %34 = vector.shape_cast %33 : vector<1x8x1xf32> to vector<8x1xf32>
    %35 = vector.broadcast %34 : vector<8x1xf32> to vector<8x128xf32>
    %36 = arith.mulf %32, %35 : vector<8x128xf32>
    %37 = arith.negf %36 : vector<8x128xf32>
    %38 = math.exp %37 : vector<8x128xf32>
    %cst_20 = arith.constant 1.000000e+00 : f32
    %39 = vector.broadcast %cst_20 : f32 to vector<8x128xf32>
    %40 = arith.addf %39, %38 : vector<8x128xf32>
    %41 = arith.divf %39, %40 : vector<8x128xf32>
    %c0_21 = arith.constant 0 : index
    %c0_22 = arith.constant 0 : index
    %c0_23 = arith.constant 0 : index
    %42 = vector.load %arg8[%c0_21, %c0_22, %c0_23] : memref<1x8x128xf32, #tpu.memory_space<vmem>>, vector<1x8x128xf32>
    %43 = vector.shape_cast %42 : vector<1x8x128xf32> to vector<8x128xf32>
    %44 = vector.shape_cast %41 : vector<8x128xf32> to vector<1x8x128xf32>
    tpu.vector_store %arg8[%c0_21, %c0_22, %c0_23], %44 {strides = array<i32>} : memref<1x8x128xf32, #tpu.memory_space<vmem>>, vector<1x8x128xf32>,
    return
  }
  func.func @transform_0(%arg0: i32, %arg1: i32) -> (i32, i32, i32) {
    %c0_i32 = arith.constant 0 : i32
    %c0_i32_0 = arith.constant 0 : i32
    return %arg0, %arg1, %c0_i32 : i32, i32, i32
  }
  func.func @transform_1(%arg0: i32, %arg1: i32) -> (i32, i32, i32) {
    %c0_i32 = arith.constant 0 : i32
    %c0_i32_0 = arith.constant 0 : i32
    %c0_i32_1 = arith.constant 0 : i32
    return %arg0, %c0_i32, %c0_i32_0 : i32, i32, i32
  }
  func.func @transform_2(%arg0: i32, %arg1: i32) -> (i32, i32, i32) {
    %c0_i32 = arith.constant 0 : i32
    %c0_i32_0 = arith.constant 0 : i32
    %c0_i32_1 = arith.constant 0 : i32
    return %arg0, %c0_i32, %c0_i32_0 : i32, i32, i32
  }
  func.func @transform_3(%arg0: i32, %arg1: i32) -> (i32, i32, i32) {
    %c0_i32 = arith.constant 0 : i32
    %c0_i32_0 = arith.constant 0 : i32
    return %arg0, %arg1, %c0_i32 : i32, i32, i32
  }
  func.func @transform_4(%arg0: i32, %arg1: i32) -> (i32, i32) {
    %c0_i32 = arith.constant 0 : i32
    %c0_i32_0 = arith.constant 0 : i32
    %c0_i32_1 = arith.constant 0 : i32
    return %c0_i32, %c0_i32_0 : i32, i32
  }
  func.func @transform_5(%arg0: i32, %arg1: i32) -> (i32, i32) {
    %c0_i32 = arith.constant 0 : i32
    %c0_i32_0 = arith.constant 0 : i32
    %c0_i32_1 = arith.constant 0 : i32
    return %c0_i32, %c0_i32_0 : i32, i32
  }
  func.func @transform_6(%arg0: i32, %arg1: i32) -> (i32, i32, i32) {
    %c0_i32 = arith.constant 0 : i32
    %c0_i32_0 = arith.constant 0 : i32
    return %arg0, %arg1, %c0_i32 : i32, i32, i32
  }
}

module attributes {stable_mosaic.version = 11 : i64} {
  func.func @object_model_kernel(%arg0: i32, %arg1: i32, %arg2: memref<1x8x32xf32, #tpu.memory_space<vmem>>, %arg3: memref<1x1x32xf32, #tpu.memory_space<vmem>>, %arg4: memref<1x1x32xf32, #tpu.memory_space<vmem>>, %arg5: memref<1x8x1xf32, #tpu.memory_space<vmem>>, %arg6: memref<32x128xf32, #tpu.memory_space<vmem>>, %arg7: memref<1x128xf32, #tpu.memory_space<vmem>>, %arg8: memref<1x8x128xf32, #tpu.memory_space<vmem>>) attributes {dimension_semantics = [#tpu.dimension_semantics<parallel>, #tpu.dimension_semantics<parallel>], iteration_bounds = array<i64: 2, 1>, scalar_prefetch = 0 : i64, scratch_operands = 0 : i64, tpu.core_type = #tpu.core_type<tc>, window_params = [{transform_indices = @transform_0, window_bounds = array<i64: 1, 8, 32>}, {transform_indices = @transform_1, window_bounds = array<i64: 1, 1, 32>}, {transform_indices = @transform_2, window_bounds = array<i64: 1, 1, 32>}, {transform_indices = @transform_3, window_bounds = array<i64: 1, 8, 1>}, {pipeline_mode = #tpu.pipeline_mode<synchronous>, transform_indices = @transform_4, window_bounds = array<i64: 32, 128>}, {pipeline_mode = #tpu.pipeline_mode<synchronous>, transform_indices = @transform_5, window_bounds = array<i64: 1, 128>}, {transform_indices = @transform_6, window_bounds = array<i64: 1, 8, 128>}]} {
    %c0 = arith.constant 0 : index
    %c0_0 = arith.constant 0 : index
    %c0_1 = arith.constant 0 : index
    %0 = vector.load %arg2[%c0, %c0_0, %c0_1] : memref<1x8x32xf32, #tpu.memory_space<vmem>>, vector<1x8x32xf32>
    %1 = vector.shape_cast %0 : vector<1x8x32xf32> to vector<8x32xf32>
    %cst = arith.constant dense<0.000000e+00> : vector<8xf32>
    %2 = vector.multi_reduction <add>, %1, %cst [1] : vector<8x32xf32> to vector<8xf32>
    %3 = vector.shape_cast %2 : vector<8xf32> to vector<8x1xf32>
    %cst_2 = arith.constant 3.200000e+01 : f32
    %4 = vector.broadcast %cst_2 : f32 to vector<8x1xf32>
    %5 = arith.divf %3, %4 : vector<8x1xf32>
    %6 = arith.mulf %1, %1 : vector<8x32xf32>
    %cst_3 = arith.constant dense<0.000000e+00> : vector<8xf32>
    %7 = vector.multi_reduction <add>, %6, %cst_3 [1] : vector<8x32xf32> to vector<8xf32>
    %8 = vector.shape_cast %7 : vector<8xf32> to vector<8x1xf32>
    %cst_4 = arith.constant 3.200000e+01 : f32
    %9 = vector.broadcast %cst_4 : f32 to vector<8x1xf32>
    %10 = arith.divf %8, %9 : vector<8x1xf32>
    %11 = arith.mulf %5, %5 : vector<8x1xf32>
    %12 = arith.subf %10, %11 : vector<8x1xf32>
    %cst_5 = arith.constant 0.000000e+00 : f32
    %13 = vector.broadcast %cst_5 : f32 to vector<8x1xf32>
    %14 = arith.maximumf %12, %13 : vector<8x1xf32>
    %15 = math.rsqrt %14 : vector<8x1xf32>
    %16 = vector.broadcast %5 : vector<8x1xf32> to vector<8x32xf32>
    %17 = arith.subf %1, %16 : vector<8x32xf32>
    %18 = vector.broadcast %15 : vector<8x1xf32> to vector<8x32xf32>
    %19 = arith.mulf %17, %18 : vector<8x32xf32>
    %c0_6 = arith.constant 0 : index
    %c0_7 = arith.constant 0 : index
    %c0_8 = arith.constant 0 : index
    %20 = vector.load %arg3[%c0_6, %c0_7, %c0_8] : memref<1x1x32xf32, #tpu.memory_space<vmem>>, vector<1x1x32xf32>
    %21 = vector.shape_cast %20 : vector<1x1x32xf32> to vector<1x32xf32>
    %22 = vector.broadcast %21 : vector<1x32xf32> to vector<8x32xf32>
    %23 = arith.mulf %19, %22 : vector<8x32xf32>
    %c0_9 = arith.constant 0 : index
    %c0_10 = arith.constant 0 : index
    %c0_11 = arith.constant 0 : index
    %24 = vector.load %arg4[%c0_9, %c0_10, %c0_11] : memref<1x1x32xf32, #tpu.memory_space<vmem>>, vector<1x1x32xf32>
    %25 = vector.shape_cast %24 : vector<1x1x32xf32> to vector<1x32xf32>
    %26 = vector.broadcast %25 : vector<1x32xf32> to vector<8x32xf32>
    %27 = arith.addf %23, %26 : vector<8x32xf32>
    %c0_12 = arith.constant 0 : index
    %c0_13 = arith.constant 0 : index
    %28 = vector.load %arg6[%c0_12, %c0_13] : memref<32x128xf32, #tpu.memory_space<vmem>>, vector<32x128xf32>
    %cst_14 = arith.constant dense<0.000000e+00> : vector<8x128xf32>
    %29 = tpu.matmul %27, %28, %cst_14 {dimension_numbers = #tpu.dot_dimension_numbers<[1], [0], [0], [1], [0, 0, 1, 1], [], []>} : vector<8x32xf32>, vector<32x128xf32>, vector<8x128xf32> -> vector<8x128xf32>
    %c0_15 = arith.constant 0 : index
    %c0_16 = arith.constant 0 : index
    %30 = vector.load %arg7[%c0_15, %c0_16] : memref<1x128xf32, #tpu.memory_space<vmem>>, vector<1x128xf32>
    %31 = vector.broadcast %30 : vector<1x128xf32> to vector<8x128xf32>
    %32 = arith.addf %29, %31 : vector<8x128xf32>
    %c0_17 = arith.constant 0 : index
    %c0_18 = arith.constant 0 : index
    %c0_19 = arith.constant 0 : index
    %33 = vector.load %arg5[%c0_17, %c0_18, %c0_19] : memref<1x8x1xf32, #tpu.memory_space<vmem>>, vector<1x8x1xf32>
    %34 = vector.shape_cast %33 : vector<1x8x1xf32> to vector<8x1xf32>
    %35 = vector.broadcast %34 : vector<8x1xf32> to vector<8x128xf32>
    %36 = arith.mulf %32, %35 : vector<8x128xf32>
    %37 = arith.negf %36 : vector<8x128xf32>
    %38 = math.exp %37 : vector<8x128xf32>
    %cst_20 = arith.constant 1.000000e+00 : f32
    %39 = vector.broadcast %cst_20 : f32 to vector<8x128xf32>
    %40 = arith.addf %39, %38 : vector<8x128xf32>
    %41 = arith.divf %39, %40 : vector<8x128xf32>
    %c0_21 = arith.constant 0 : index
    %c0_22 = arith.constant 0 : index
    %c0_23 = arith.constant 0 : index
    %42 = vector.load %arg8[%c0_21, %c0_22, %c0_23] : memref<1x8x128xf32, #tpu.memory_space<vmem>>, vector<1x8x128xf32>
    %43 = vector.shape_cast %42 : vector<1x8x128xf32> to vector<8x128xf32>
    %44 = vector.shape_cast %41 : vector<8x128xf32> to vector<1x8x128xf32>
    tpu.vector_store %arg8[%c0_21, %c0_22, %c0_23], %44 {strides = array<i32>} : memref<1x8x128xf32, #tpu.memory_space<vmem>>, vector<1x8x128xf32>,
    return
  }
  func.func @transform_0(%arg0: i32, %arg1: i32) -> (i32, i32, i32) {
    %c0_i32 = arith.constant 0 : i32
    %c0_i32_0 = arith.constant 0 : i32
    return %arg0, %arg1, %c0_i32 : i32, i32, i32
  }
  func.func @transform_1(%arg0: i32, %arg1: i32) -> (i32, i32, i32) {
    %c0_i32 = arith.constant 0 : i32
    %c0_i32_0 = arith.constant 0 : i32
    %c0_i32_1 = arith.constant 0 : i32
    return %arg0, %c0_i32, %c0_i32_0 : i32, i32, i32
  }
  func.func @transform_2(%arg0: i32, %arg1: i32) -> (i32, i32, i32) {
    %c0_i32 = arith.constant 0 : i32
    %c0_i32_0 = arith.constant 0 : i32
    %c0_i32_1 = arith.constant 0 : i32
    return %arg0, %c0_i32, %c0_i32_0 : i32, i32, i32
  }
  func.func @transform_3(%arg0: i32, %arg1: i32) -> (i32, i32, i32) {
    %c0_i32 = arith.constant 0 : i32
    %c0_i32_0 = arith.constant 0 : i32
    return %arg0, %arg1, %c0_i32 : i32, i32, i32
  }
  func.func @transform_4(%arg0: i32, %arg1: i32) -> (i32, i32) {
    %c0_i32 = arith.constant 0 : i32
    %c0_i32_0 = arith.constant 0 : i32
    %c0_i32_1 = arith.constant 0 : i32
    return %c0_i32, %c0_i32_0 : i32, i32
  }
  func.func @transform_5(%arg0: i32, %arg1: i32) -> (i32, i32) {
    %c0_i32 = arith.constant 0 : i32
    %c0_i32_0 = arith.constant 0 : i32
    %c0_i32_1 = arith.constant 0 : i32
    return %c0_i32, %c0_i32_0 : i32, i32
  }
  func.func @transform_6(%arg0: i32, %arg1: i32) -> (i32, i32, i32) {
    %c0_i32 = arith.constant 0 : i32
    %c0_i32_0 = arith.constant 0 : i32
    return %arg0, %arg1, %c0_i32 : i32, i32, i32
  }
}

</mosaic_0001>

<bundles_post_ra>
// kernel: tpu_custom_call.1
= control target key start
LH: loop header
LB: loop body
LE: loop exit
PB: predicated region body
PF: predicated region fallthrough
CT: control target
= control target key end

     0   :  { %s1131_s0 = inlined_call_operand.vmem [shape: f32[2,8,32], index: 0, kind: input, shape index: {}]   ;;  %s1132_s1 = inlined_call_operand.vmem [shape: f32[2,1,32], index: 1, kind: input, shape index: {}]   ;;  %s1133_s2 = inlined_call_operand.hbm [shape: f32[2,1,32], index: 2, kind: input, shape index: {}]   ;;  %s1134_s3 = inlined_call_operand.vmem [shape: f32[2,8,1], index: 3, kind: input, shape index: {}]   ;;  %s1135_s4 = inlined_call_operand.hbm [shape: f32[32,128], index: 4, kind: input, shape index: {}]   ;;  %s1136_s5 = inlined_call_operand.vmem [shape: f32[1,128], index: 5, kind: input, shape index: {}]   ;;  %s1137_s6 = inlined_call_operand.hbm [shape: f32[2,8,128], index: 6, kind: output, shape index: {}]  }
   0x1   :  { %1139 = sst [smem:[#allocation11_spill]] %s1135_s4 }
   0x2   :  { %11 = vsyncpa [#allocation3], 0 }
   0x3   :  { %13 = vsyncpa [#allocation3 + $0x1], 0 }
   0x4   :  { %14 = vsyncpa [#allocation6], 0 }
   0x5   :  { %15 = vsyncpa [#allocation4], 0 }
   0x6   :  { %17 = vsyncpa [#allocation4 + $0x1], 0  ;;  %s940_s21 = smov 0   ;;  %s942_s22 = smov 0  }
   0x7   :  { %s944_s23 = smov 0   ;;  %s946_s24 = smov 0  }
   0x8   :  { %s948_s25 = smov 0   ;;  %s950_s26 = smov 0  }
   0x9 LB: > { %s635_s27 = sadd.s32 4294967295, %s895_s26   ;;  %s636_s28 = sadd.s32 4294967294, %s895_s26   ;;  %s895_s26 = sphi %s950_s26, %s23_s26   ;;  %s891_s25 = sphi %s948_s25, %s1156_s25   ;;  %s887_s24 = sphi %s946_s24, %s1155_s24   ;;  %s883_s23 = sphi %s944_s23, %s1154_s23   ;;  %s879_s22 = sphi %s942_s22, %s1153_s22   ;;  %s875_s21 = sphi %s940_s21, %s1152_s21  }
   0xa   : > { %p109_p0 = scmp.ne.s32.totalorder %s879_s22, %s875_s21  ;;  %p974_p1 = scmp.eq.s32.totalorder %s635_s27, 0 }
   0xb   : > { %p978_p2 = scmp.eq.s32.totalorder %s635_s27, 1  ;;  %p211_p3 = scmp.eq.s32.totalorder %s636_s28, 1 }
   0xc   : > { %p984_p4 = por %p974_p1, %p109_p0  ;;  %p637_p5 = scmp.ge.s32.totalorder %s895_s26, 1 }
   0xd   : > { %p989_p6 = por %p211_p3, %p109_p0  ;;  %p218_p7 = scmp.lt.s32.totalorder %s895_s26, 3 }
   0xe   : > { %s1142_s7 = scalar_select %p984_p4, 1, 0 }
   0xf   : > { %s1143_s8 = scalar_select %p989_p6, 1, 0 }
  0x10   : > { %p994_p8 = pnand %p637_p5, %p218_p7  ;;  %s897_s10 = smov [#allocation5]  }
  0x11   : > { %s230_s11 = sshll.u32 %s897_s10, 4  ;;  %s35_s13 = sadd.s32 1, %s891_s25  ;;  %s231_s11 = int_to_ptr.vmem [resolvable:$true] %s230_s11 }
  0x12   : > { %p679_p9 = pneg %p994_p8  ;;  %s768_s14 = scalar_lea.vmem %s231_s11, 512 }
  0x13   : > { %p769_p13 = scmp.ne.s32.totalorder %s231_s11, %s768_s14  ;;  %p776_p5 = scmp.lt.s32.totalorder %s231_s11, %s231_s11 }
  0x14   : > { %p1003_p11 = pnand %p679_p9, %p974_p1  ;;  %p777_p7 = scmp.lt.s32.totalorder %s768_s14, %s768_s14 }
  0x16   : > { %p759_p12 = pneg %p1003_p11  ;;  %p778_p6 = por %p777_p7, %p776_p5 }
  0x18   : > { %p771_p0 = pnand %p769_p13, %p759_p12 }
  0x1a   : > { %p772_p3 = pneg %p771_p0 }
  0x1c   : > { %p779_p4 = pnand %p778_p6, %p772_p3 }
  0x1e   : > { %782 = shalt.err (!%p779_p4)
}
  0x1f   : > { %s898_s15 = smov 128   ;;  %s899_s16 = smov 8  }
  0x20   : > { %s1146_s4 = sld [smem:[#allocation11_spill]]  ;;  %p37_p6 = scmp.ge.s32.totalorder %s35_s13, 2 }
  0x21   : > { %p103_p4 = scmp.ne.s32.totalorder %s883_s23, %s879_s22  ;;  %p104_p9 = scmp.eq.s32.totalorder %s895_s26, 0 }
  0x22   : > { %s1158_s13 = smov (%p37_p6, %s35_s13), 0  ;;  %s96_s19 = sadd.s32 1, %s883_s23 }
  0x23   : > { %p1023_p12 = por %p978_p2, %p103_p4  ;;  %s93_s27 = ssub.s32 %s891_s25, %s1158_s13 }
  0x24   : > { %p105_p13 = por %p104_p9, %p103_p4  ;;  %p94_p0 = scmp.eq.s32.totalorder %s93_s27, 0 }
  0x25   : > { %s263_s28 = sand.u32 1, %s883_s23   ;;  %p692_p3 = scmp.lt.s32.totalorder %s895_s26, 2 }
  0x26   : > { %682 = dma.hbm_to_vmem [thread:$0]  (!%p1003_p11), %s1146_s4, 512, %s231_s11, [#allocation6], %s898_s15, %s898_s15, %s899_s16  }
  0x27   : > { %s1032_s10 = scalar_select %p94_p0, %s883_s23, %s96_s19  }
  0x28   : > { %s640_s11 = sshll.u32 %s891_s25, 4  ;;  %s266_s12 = scalar_lea.vmem [#allocation2], %s263_s28 }
  0x29   : > { %s273_s14 = sshll.u32 %s266_s12, 4  ;;  %s271_s17 = scalar_lea.hbm %s1133_s2, %s640_s11  ;;  %s274_s14 = int_to_ptr.vmem [resolvable:$true] %s273_s14 }
  0x2a   : > { %p1038_p11 = pnand %p692_p3, %p105_p13  ;;  %s264_s18 = scalar_lea.sflag [#allocation3], %s263_s28 }
  0x2b   : > { %s796_s27 = scalar_lea.vmem %s274_s14, 16  ;;  %s900_s19 = smov [#allocation2]  }
  0x2c   : > { %p785_p2 = pneg %p1038_p11  ;;  %p797_p5 = scmp.ne.s32.totalorder %s274_s14, %s796_s27 }
  0x2d   : > { %s801_s4 = sshll.u32 %s900_s19, 4  ;;  %s802_s4 = int_to_ptr.vmem [resolvable:$false] %s801_s4 }
  0x2e   : > { %p799_p7 = pnand %p797_p5, %p785_p2  ;;  %s803_s12 = scalar_lea.vmem %s802_s4, 32 }
  0x2f   : > { %p804_p4 = scmp.lt.s32.totalorder %s274_s14, %s802_s4  ;;  %p805_p9 = scmp.lt.s32.totalorder %s803_s12, %s796_s27 }
  0x30   : > { %p800_p6 = pneg %p799_p7 }
  0x31   : > { %p806_p0 = por %p805_p9, %p804_p4 }
  0x33   : > { %p807_p10 = pnand %p806_p0, %p800_p6 }
  0x35   : > { %810 = shalt.err (!%p807_p10)
}
  0x36   : > { %686 = dma.hbm_to_vmem [thread:$0]  (!%p1038_p11), %s271_s17, 16, %s274_s14, %s264_s18  }
  0x37   : > { %292 = sbr.rel (%p994_p8) target bundleno = 481 (0x1e1), region = 44  ;;  %s1049_s28 = sand.u32 (!%p994_p8), 1, %s879_s22  }
  0x38   : > { %s295_s11 = scalar_lea.sflag (!%p994_p8), [#allocation3], %s1049_s28  ;;  %s297_s15 = scalar_lea.vmem (!%p994_p8), [#allocation2], %s1049_s28 }
  0x39   : > { %p1149_p13 = scmp.ne.s32.totalorder (!%p994_p8), %s1142_s7, 0 }
  0x3c   : > { %862 = dma.done.wait (%p1149_p13), %s295_s11, 16  }
  0x3d   : > { %864 = vsyncadd (%p1149_p13), %s295_s11, 4294967280 }
  0x3e   : > { %866 = dma.done.wait (%p974_p1), [#allocation6], 512  }
  0x3f   : > { %868 = vsyncadd (%p974_p1), [#allocation6], 4294966784  ;;  %p346_p8 = scmp.lt.s32.totalorder %s887_s24, 1  ;;  %vm364_vm0 = vcmask 261120   ;;  %v400_v4 = vld [vmem:[#allocation5 + $0x18] sm:$0xff]  ;;  %v901_v5 = vmov 0.0  }
  0x40   : > { %660 = vmatprep.subr.mxu0 %v901_v5  ;;  %v399_v6 = vld [vmem:[#allocation5 + $0x10] sm:$0xff]  ;;  %vm902_vm1 = vmmov 0   ;;  %v398_v7 = vld [vmem:[#allocation5 + $0x8] sm:$0xff]  ;;  %v397_v8 = vld [vmem:[#allocation5] sm:$0xff]  ;;  %v903_v9 = vmov 0   ;;  %s496_s7 = scalar_lea.sflag [#allocation4], %s1049_s28 }
  0x41   : > { %s1063_s4 = scalar_select %p346_p8, %s887_s24, 1  ;;  %668 = vmatprep.mubr.msk.f32.mxu0 %vm902_vm1, %v901_v5  ;;  %661 = vmatpush3.msra.mxu0 %v400_v4  ;;  %v647_v22 = vld [vmem:[%s297_s15] ss:$0 sm:$0xff] }
  0x42   : > { %662 = vmatprep.subr.mxu0 %v901_v5  ;;  %749 = vset.pattern.permute.xlu1 %v903_v9  ;;  %v648_v25 = vld [vmem:[%s1136_s5] ss:$0 sm:$0xff]  ;;  %s643_s15 = sshll.u32 %s1049_s28, 3  ;;  %s904_s18 = smov [#allocation7]  }
  0x43   : > { %s644_s9 = sshll.u32 %s1063_s4, 3  ;;  %663 = vmatpush3.msra.mxu0 %v399_v6  ;;  %750 = vset.pattern.permute.xlu0 %v903_v9  ;;  %s355_s19 = scalar_lea.vmem %s1132_s1, %s1063_s4 }
  0x44   : > { %s352_s17 = scalar_lea.vmem %s1131_s0, %s644_s9  ;;  %664 = vmatprep.subr.mxu0 %v901_v5  ;;  %s362_s30 = scalar_lea.vmem %s1134_s3, %s644_s9  ;;  %v646_v20 = vld [vmem:[%s355_s19] ss:$0 sm:$0xff] }
  0x45   : > { %v363_v0 = vld [vmem:[%s352_s17] sm:$0xff]  ;;  %665 = vmatpush3.msra.mxu0 %v398_v7  ;;  %s652_s4 = sshll.u32 %s887_s24, 7  ;;  %s345_s9 = scalar_lea.vmem [#allocation7], %s643_s15 }
  0x46   : > { %v365_v1 = vsel %vm364_vm0, %v363_v0, 0.0  ;;  %v370_v2 = vmul.f32 %v363_v0, %v363_v0  ;;  %666 = vmatprep.subr.mxu0 %v901_v5  ;;  %v481_v10 = vld [vmem:[%s362_s30] sm:$0xff]  ;;  %s510_s14 = sshll.u32 %s345_s9, 4  ;;  %s1089_s29 = scalar_lea.hbm %s1137_s6, %s652_s4  ;;  %s511_s14 = int_to_ptr.vmem [resolvable:$true] %s510_s14 }
  0x47   : > { %366 = vadd.xlane.f32.xlu0 %v365_v1  ;;  %667 = vmatpush3.msra.mxu0 %v397_v8  ;;  %s811_s30 = scalar_lea.vmem %s511_s14, 128  ;;  %s815_s27 = sshll.u32 %s904_s18, 4  ;;  %s816_s27 = int_to_ptr.vmem [resolvable:$false] %s815_s27 }
  0x48   : > { %v371_v3 = vsel %vm364_vm0, %v370_v2, 0.0  ;;  %484 = vperm.xlu1 %749, %v481_v10   ;;  %p812_p1 = scmp.ne.s32.totalorder %s511_s14, %s811_s30  ;;  %s817_s24 = scalar_lea.vmem %s816_s27, 256 }
  0x49   : > { %p818_p11 = scmp.lt.s32.totalorder %s511_s14, %s816_s27  ;;  %p819_p2 = scmp.lt.s32.totalorder %s817_s24, %s811_s30 }
  0x4a   : > { %p813_p10 = pnand %p812_p1, %p1023_p12 }
  0x4b   : > { %372 = vadd.xlane.f32.xlu0 %v371_v3  ;;  %p820_p5 = por %p819_p2, %p818_p11 }
  0x4c   : > { %p814_p3 = pneg %p813_p10 }
  0x4e   : > { %p821_p7 = pnand %p820_p5, %p814_p3 }
  0xc3   : > { %v485_v27 = vpop.permute.xlu1 %484 }
  0xd0   : > { %v367_v11 = vpop.xlane.xlu0 %366 }
  0xd1   : > { %v369_v12 = vmul.f32 0.03125, %v367_v11 }
  0xd3   : > { %v375_v14 = vmul.f32 %v369_v12, %v369_v12  ;;  %v379_v18 = vsub.f32 %v363_v0, %v369_v12 }
  0xd4   : > { %v373_v13 = vpop.xlane.xlu0 %372 }
  0xd5   : > { %v374_v15 = vmul.f32 0.03125, %v373_v13 }
  0xd7   : > { %v376_v16 = vsub.f32 %v374_v15, %v375_v14 }
  0xd9   : > { %v377_v17 = vmax.f32 %v376_v16, 0.0 }
  0xdb   : > { %751 = vrsqrt.f32 %v377_v17 }
  0xe8   : > { %v752_v19 = vpop.eup %751 }
  0xe9   : > { %v380_v21 = vmul.f32 %v752_v19, %v379_v18 }
  0xeb   : > { %v388_v23 = vmul.f32 %v646_v20, %v380_v21 }
  0xed   : > { %v396_v24 = vadd.f32 %v647_v22, %v388_v23 }
  0xef   : > { %669 = vmatmul.mubr.msk.f32.vlgmr.msra.gmra.mxu0 %vm364_vm0, %v396_v24 }
 0x1af   : > { %v477_v26 = vpop.f32.mrf.mxu0 }
 0x1b0   : > { %v478_v28 = vadd.f32 %v648_v25, %v477_v26 }
 0x1b1   : > { %v670_v29 = vpop.f32.mrf.mxu0 }
 0x1b2   : > { %v487_v30 = vmul.f32 %v485_v27, %v478_v28 }
 0x1b4   : > { %v650_v31 = vmul.f32 -1.442695, %v487_v30 }
 0x1b6   : > { %753 = vpow2.f32 %v650_v31 }
 0x1c3   : > { %v754_v32 = vpop.eup %753 }
 0x1c4   : > { %v491_v33 = vadd.f32 1.0, %v754_v32 }
 0x1c6   : > { %755 = vrcp.f32 %v491_v33 }
 0x1d3   : > { %v756_v34 = vpop.eup %755 }
 0x1d4   : > { %494 = vst [vmem:[%s345_s9] sm:$0xff] %v756_v34 }
 0x1d5   : > { %824 = shalt.err (!%p821_p7)
}
 0x1d6   : > { %s825_s19 = scalar_lea.hbm %s1089_s29, 128  ;;  %s829_s11 = scalar_lea.hbm %s1137_s6, 256 }
 0x1d7   : > { %p826_p6 = scmp.ne.s32.totalorder %s1089_s29, %s825_s19  ;;  %p830_p0 = scmp.lt.s32.totalorder %s1089_s29, %s1137_s6 }
 0x1d8   : > { %p831_p13 = scmp.lt.s32.totalorder %s829_s11, %s825_s19 }
 0x1d9   : > { %p827_p4 = pnand %p826_p6, %p1023_p12 }
 0x1da   : > { %p832_p8 = por %p831_p13, %p830_p0 }
 0x1db   : > { %p828_p9 = pneg %p827_p4 }
 0x1dd   : > { %p833_p1 = pnand %p832_p8, %p828_p9 }
 0x1df   : > { %836 = shalt.err (!%p833_p1)
}
 0x1e0   : > { %677 = dma.vmem_to_hbm [thread:$0]  (%p1023_p12), %s511_s14, 128, %s1089_s29, %s496_s7  }
 0x1e1 PF: > { %s522_s9 = sand.u32 1, %s875_s21   ;;  %p1150_p10 = scmp.ne.s32.totalorder %s1143_s8, 0 }
 0x1e2   : > { %p1151_p3 = scmp.ge.s32.totalorder %s895_s26, 2  ;;  %s523_s16 = scalar_lea.sflag [#allocation4], %s522_s9 }
 0x1e4   : > { %p688_p11 = pnand %p1151_p3, %p1150_p10 }
 0x1e6   : > { %p689_p2 = pneg %p688_p11 }
 0x1e8   : > { %870 = dma.done.wait (%p689_p2), %s523_s16, 128  }
 0x1e9   : > { %872 = vsyncadd (%p689_p2), %s523_s16, 4294967168  ;;  %s23_s26 = sadd.s32 1, %s895_s26   ;;  %s1152_s21 = smov %s879_s22 }
 0x1ea   : > { %p20_p5 = scmp.ge.s32.totalorder %s23_s26, 4   ;;  %s1153_s22 = smov %s883_s23 }
 0x1eb   : > { %s1154_s23 = smov %s1032_s10  ;;  %s1155_s24 = smov %s891_s25 }
 0x1ec   : > { %s1156_s25 = smov %s1158_s13  ;;  %22 = sbr.rel (!%p20_p5) target bundleno = 9 (0x9), region = 102 }
 0x1f1   :  { %528 = vsyncpa [#allocation3], 1 }
 0x1f2   :  { %530 = vsyncpa [#allocation3 + $0x1], 1 }
 0x1f3   :  { %531 = vsyncpa [#allocation6], 1 }
 0x1f4   :  { %532 = vsyncpa [#allocation4], 1 }
 0x1f5   :  { %534 = vsyncpa [#allocation4 + $0x1], 1 }

// kernel: tpu_custom_call.1
= control target key start
LH: loop header
LB: loop body
LE: loop exit
PB: predicated region body
PF: predicated region fallthrough
CT: control target
= control target key end

     0   :  { %s1131_s0 = inlined_call_operand.vmem [shape: f32[2,8,32], index: 0, kind: input, shape index: {}]   ;;  %s1132_s1 = inlined_call_operand.vmem [shape: f32[2,1,32], index: 1, kind: input, shape index: {}]   ;;  %s1133_s2 = inlined_call_operand.hbm [shape: f32[2,1,32], index: 2, kind: input, shape index: {}]   ;;  %s1134_s3 = inlined_call_operand.vmem [shape: f32[2,8,1], index: 3, kind: input, shape index: {}]   ;;  %s1135_s4 = inlined_call_operand.hbm [shape: f32[32,128], index: 4, kind: input, shape index: {}]   ;;  %s1136_s5 = inlined_call_operand.vmem [shape: f32[1,128], index: 5, kind: input, shape index: {}]   ;;  %s1137_s6 = inlined_call_operand.hbm [shape: f32[2,8,128], index: 6, kind: output, shape index: {}]  }
   0x1   :  { %1139 = sst [smem:[#allocation11_spill]] %s1135_s4 }
   0x2   :  { %11 = vsyncpa [#allocation3], 0 }
   0x3   :  { %13 = vsyncpa [#allocation3 + $0x1], 0 }
   0x4   :  { %14 = vsyncpa [#allocation6], 0 }
   0x5   :  { %15 = vsyncpa [#allocation4], 0 }
   0x6   :  { %17 = vsyncpa [#allocation4 + $0x1], 0  ;;  %s940_s21 = smov 0   ;;  %s942_s22 = smov 0  }
   0x7   :  { %s944_s23 = smov 0   ;;  %s946_s24 = smov 0  }
   0x8   :  { %s948_s25 = smov 0   ;;  %s950_s26 = smov 0  }
   0x9 LB: > { %s635_s27 = sadd.s32 4294967295, %s895_s26   ;;  %s636_s28 = sadd.s32 4294967294, %s895_s26   ;;  %s895_s26 = sphi %s950_s26, %s23_s26   ;;  %s891_s25 = sphi %s948_s25, %s1156_s25   ;;  %s887_s24 = sphi %s946_s24, %s1155_s24   ;;  %s883_s23 = sphi %s944_s23, %s1154_s23   ;;  %s879_s22 = sphi %s942_s22, %s1153_s22   ;;  %s875_s21 = sphi %s940_s21, %s1152_s21  }
   0xa   : > { %p109_p0 = scmp.ne.s32.totalorder %s879_s22, %s875_s21  ;;  %p974_p1 = scmp.eq.s32.totalorder %s635_s27, 0 }
   0xb   : > { %p978_p2 = scmp.eq.s32.totalorder %s635_s27, 1  ;;  %p211_p3 = scmp.eq.s32.totalorder %s636_s28, 1 }
   0xc   : > { %p984_p4 = por %p974_p1, %p109_p0  ;;  %p637_p5 = scmp.ge.s32.totalorder %s895_s26, 1 }
   0xd   : > { %p989_p6 = por %p211_p3, %p109_p0  ;;  %p218_p7 = scmp.lt.s32.totalorder %s895_s26, 3 }
   0xe   : > { %s1142_s7 = scalar_select %p984_p4, 1, 0 }
   0xf   : > { %s1143_s8 = scalar_select %p989_p6, 1, 0 }
  0x10   : > { %p994_p8 = pnand %p637_p5, %p218_p7  ;;  %s897_s10 = smov [#allocation5]  }
  0x11   : > { %s230_s11 = sshll.u32 %s897_s10, 4  ;;  %s35_s13 = sadd.s32 1, %s891_s25  ;;  %s231_s11 = int_to_ptr.vmem [resolvable:$true] %s230_s11 }
  0x12   : > { %p679_p9 = pneg %p994_p8  ;;  %s768_s14 = scalar_lea.vmem %s231_s11, 512 }
  0x13   : > { %p769_p13 = scmp.ne.s32.totalorder %s231_s11, %s768_s14  ;;  %p776_p5 = scmp.lt.s32.totalorder %s231_s11, %s231_s11 }
  0x14   : > { %p1003_p11 = pnand %p679_p9, %p974_p1  ;;  %p777_p7 = scmp.lt.s32.totalorder %s768_s14, %s768_s14 }
  0x16   : > { %p759_p12 = pneg %p1003_p11  ;;  %p778_p6 = por %p777_p7, %p776_p5 }
  0x18   : > { %p771_p0 = pnand %p769_p13, %p759_p12 }
  0x1a   : > { %p772_p3 = pneg %p771_p0 }
  0x1c   : > { %p779_p4 = pnand %p778_p6, %p772_p3 }
  0x1e   : > { %782 = shalt.err (!%p779_p4)
}
  0x1f   : > { %s898_s15 = smov 128   ;;  %s899_s16 = smov 8  }
  0x20   : > { %s1146_s4 = sld [smem:[#allocation11_spill]]  ;;  %p37_p6 = scmp.ge.s32.totalorder %s35_s13, 2 }
  0x21   : > { %p103_p4 = scmp.ne.s32.totalorder %s883_s23, %s879_s22  ;;  %p104_p9 = scmp.eq.s32.totalorder %s895_s26, 0 }
  0x22   : > { %s1158_s13 = smov (%p37_p6, %s35_s13), 0  ;;  %s96_s19 = sadd.s32 1, %s883_s23 }
  0x23   : > { %p1023_p12 = por %p978_p2, %p103_p4  ;;  %s93_s27 = ssub.s32 %s891_s25, %s1158_s13 }
  0x24   : > { %p105_p13 = por %p104_p9, %p103_p4  ;;  %p94_p0 = scmp.eq.s32.totalorder %s93_s27, 0 }
  0x25   : > { %s263_s28 = sand.u32 1, %s883_s23   ;;  %p692_p3 = scmp.lt.s32.totalorder %s895_s26, 2 }
  0x26   : > { %682 = dma.hbm_to_vmem [thread:$0]  (!%p1003_p11), %s1146_s4, 512, %s231_s11, [#allocation6], %s898_s15, %s898_s15, %s899_s16  }
  0x27   : > { %s1032_s10 = scalar_select %p94_p0, %s883_s23, %s96_s19  }
  0x28   : > { %s640_s11 = sshll.u32 %s891_s25, 4  ;;  %s266_s12 = scalar_lea.vmem [#allocation2], %s263_s28 }
  0x29   : > { %s273_s14 = sshll.u32 %s266_s12, 4  ;;  %s271_s17 = scalar_lea.hbm %s1133_s2, %s640_s11  ;;  %s274_s14 = int_to_ptr.vmem [resolvable:$true] %s273_s14 }
  0x2a   : > { %p1038_p11 = pnand %p692_p3, %p105_p13  ;;  %s264_s18 = scalar_lea.sflag [#allocation3], %s263_s28 }
  0x2b   : > { %s796_s27 = scalar_lea.vmem %s274_s14, 16  ;;  %s900_s19 = smov [#allocation2]  }
  0x2c   : > { %p785_p2 = pneg %p1038_p11  ;;  %p797_p5 = scmp.ne.s32.totalorder %s274_s14, %s796_s27 }
  0x2d   : > { %s801_s4 = sshll.u32 %s900_s19, 4  ;;  %s802_s4 = int_to_ptr.vmem [resolvable:$false] %s801_s4 }
  0x2e   : > { %p799_p7 = pnand %p797_p5, %p785_p2  ;;  %s803_s12 = scalar_lea.vmem %s802_s4, 32 }
  0x2f   : > { %p804_p4 = scmp.lt.s32.totalorder %s274_s14, %s802_s4  ;;  %p805_p9 = scmp.lt.s32.totalorder %s803_s12, %s796_s27 }
  0x30   : > { %p800_p6 = pneg %p799_p7 }
  0x31   : > { %p806_p0 = por %p805_p9, %p804_p4 }
  0x33   : > { %p807_p10 = pnand %p806_p0, %p800_p6 }
  0x35   : > { %810 = shalt.err (!%p807_p10)
}
  0x36   : > { %686 = dma.hbm_to_vmem [thread:$0]  (!%p1038_p11), %s271_s17, 16, %s274_s14, %s264_s18  }
  0x37   : > { %292 = sbr.rel (%p994_p8) target bundleno = 481 (0x1e1), region = 44  ;;  %s1049_s28 = sand.u32 (!%p994_p8), 1, %s879_s22  }
  0x38   : > { %s295_s11 = scalar_lea.sflag (!%p994_p8), [#allocation3], %s1049_s28  ;;  %s297_s15 = scalar_lea.vmem (!%p994_p8), [#allocation2], %s1049_s28 }
  0x39   : > { %p1149_p13 = scmp.ne.s32.totalorder (!%p994_p8), %s1142_s7, 0 }
  0x3c   : > { %862 = dma.done.wait (%p1149_p13), %s295_s11, 16  }
  0x3d   : > { %864 = vsyncadd (%p1149_p13), %s295_s11, 4294967280 }
  0x3e   : > { %866 = dma.done.wait (%p974_p1), [#allocation6], 512  }
  0x3f   : > { %868 = vsyncadd (%p974_p1), [#allocation6], 4294966784  ;;  %p346_p8 = scmp.lt.s32.totalorder %s887_s24, 1  ;;  %vm364_vm0 = vcmask 261120   ;;  %v400_v4 = vld [vmem:[#allocation5 + $0x18] sm:$0xff]  ;;  %v901_v5 = vmov 0.0  }
  0x40   : > { %660 = vmatprep.subr.mxu0 %v901_v5  ;;  %v399_v6 = vld [vmem:[#allocation5 + $0x10] sm:$0xff]  ;;  %vm902_vm1 = vmmov 0   ;;  %v398_v7 = vld [vmem:[#allocation5 + $0x8] sm:$0xff]  ;;  %v397_v8 = vld [vmem:[#allocation5] sm:$0xff]  ;;  %v903_v9 = vmov 0   ;;  %s496_s7 = scalar_lea.sflag [#allocation4], %s1049_s28 }
  0x41   : > { %s1063_s4 = scalar_select %p346_p8, %s887_s24, 1  ;;  %668 = vmatprep.mubr.msk.f32.mxu0 %vm902_vm1, %v901_v5  ;;  %661 = vmatpush3.msra.mxu0 %v400_v4  ;;  %v647_v22 = vld [vmem:[%s297_s15] ss:$0 sm:$0xff] }
  0x42   : > { %662 = vmatprep.subr.mxu0 %v901_v5  ;;  %749 = vset.pattern.permute.xlu1 %v903_v9  ;;  %v648_v25 = vld [vmem:[%s1136_s5] ss:$0 sm:$0xff]  ;;  %s643_s15 = sshll.u32 %s1049_s28, 3  ;;  %s904_s18 = smov [#allocation7]  }
  0x43   : > { %s644_s9 = sshll.u32 %s1063_s4, 3  ;;  %663 = vmatpush3.msra.mxu0 %v399_v6  ;;  %750 = vset.pattern.permute.xlu0 %v903_v9  ;;  %s355_s19 = scalar_lea.vmem %s1132_s1, %s1063_s4 }
  0x44   : > { %s352_s17 = scalar_lea.vmem %s1131_s0, %s644_s9  ;;  %664 = vmatprep.subr.mxu0 %v901_v5  ;;  %s362_s30 = scalar_lea.vmem %s1134_s3, %s644_s9  ;;  %v646_v20 = vld [vmem:[%s355_s19] ss:$0 sm:$0xff] }
  0x45   : > { %v363_v0 = vld [vmem:[%s352_s17] sm:$0xff]  ;;  %665 = vmatpush3.msra.mxu0 %v398_v7  ;;  %s652_s4 = sshll.u32 %s887_s24, 7  ;;  %s345_s9 = scalar_lea.vmem [#allocation7], %s643_s15 }
  0x46   : > { %v365_v1 = vsel %vm364_vm0, %v363_v0, 0.0  ;;  %v370_v2 = vmul.f32 %v363_v0, %v363_v0  ;;  %666 = vmatprep.subr.mxu0 %v901_v5  ;;  %v481_v10 = vld [vmem:[%s362_s30] sm:$0xff]  ;;  %s510_s14 = sshll.u32 %s345_s9, 4  ;;  %s1089_s29 = scalar_lea.hbm %s1137_s6, %s652_s4  ;;  %s511_s14 = int_to_ptr.vmem [resolvable:$true] %s510_s14 }
  0x47   : > { %366 = vadd.xlane.f32.xlu0 %v365_v1  ;;  %667 = vmatpush3.msra.mxu0 %v397_v8  ;;  %s811_s30 = scalar_lea.vmem %s511_s14, 128  ;;  %s815_s27 = sshll.u32 %s904_s18, 4  ;;  %s816_s27 = int_to_ptr.vmem [resolvable:$false] %s815_s27 }
  0x48   : > { %v371_v3 = vsel %vm364_vm0, %v370_v2, 0.0  ;;  %484 = vperm.xlu1 %749, %v481_v10   ;;  %p812_p1 = scmp.ne.s32.totalorder %s511_s14, %s811_s30  ;;  %s817_s24 = scalar_lea.vmem %s816_s27, 256 }
  0x49   : > { %p818_p11 = scmp.lt.s32.totalorder %s511_s14, %s816_s27  ;;  %p819_p2 = scmp.lt.s32.totalorder %s817_s24, %s811_s30 }
  0x4a   : > { %p813_p10 = pnand %p812_p1, %p1023_p12 }
  0x4b   : > { %372 = vadd.xlane.f32.xlu0 %v371_v3  ;;  %p820_p5 = por %p819_p2, %p818_p11 }
  0x4c   : > { %p814_p3 = pneg %p813_p10 }
  0x4e   : > { %p821_p7 = pnand %p820_p5, %p814_p3 }
  0xc3   : > { %v485_v27 = vpop.permute.xlu1 %484 }
  0xd0   : > { %v367_v11 = vpop.xlane.xlu0 %366 }
  0xd1   : > { %v369_v12 = vmul.f32 0.03125, %v367_v11 }
  0xd3   : > { %v375_v14 = vmul.f32 %v369_v12, %v369_v12  ;;  %v379_v18 = vsub.f32 %v363_v0, %v369_v12 }
  0xd4   : > { %v373_v13 = vpop.xlane.xlu0 %372 }
  0xd5   : > { %v374_v15 = vmul.f32 0.03125, %v373_v13 }
  0xd7   : > { %v376_v16 = vsub.f32 %v374_v15, %v375_v14 }
  0xd9   : > { %v377_v17 = vmax.f32 %v376_v16, 0.0 }
  0xdb   : > { %751 = vrsqrt.f32 %v377_v17 }
  0xe8   : > { %v752_v19 = vpop.eup %751 }
  0xe9   : > { %v380_v21 = vmul.f32 %v752_v19, %v379_v18 }
  0xeb   : > { %v388_v23 = vmul.f32 %v646_v20, %v380_v21 }
  0xed   : > { %v396_v24 = vadd.f32 %v647_v22, %v388_v23 }
  0xef   : > { %669 = vmatmul.mubr.msk.f32.vlgmr.msra.gmra.mxu0 %vm364_vm0, %v396_v24 }
 0x1af   : > { %v477_v26 = vpop.f32.mrf.mxu0 }
 0x1b0   : > { %v478_v28 = vadd.f32 %v648_v25, %v477_v26 }
 0x1b1   : > { %v670_v29 = vpop.f32.mrf.mxu0 }
 0x1b2   : > { %v487_v30 = vmul.f32 %v485_v27, %v478_v28 }
 0x1b4   : > { %v650_v31 = vmul.f32 -1.442695, %v487_v30 }
 0x1b6   : > { %753 = vpow2.f32 %v650_v31 }
 0x1c3   : > { %v754_v32 = vpop.eup %753 }
 0x1c4   : > { %v491_v33 = vadd.f32 1.0, %v754_v32 }
 0x1c6   : > { %755 = vrcp.f32 %v491_v33 }
 0x1d3   : > { %v756_v34 = vpop.eup %755 }
 0x1d4   : > { %494 = vst [vmem:[%s345_s9] sm:$0xff] %v756_v34 }
 0x1d5   : > { %824 = shalt.err (!%p821_p7)
}
 0x1d6   : > { %s825_s19 = scalar_lea.hbm %s1089_s29, 128  ;;  %s829_s11 = scalar_lea.hbm %s1137_s6, 256 }
 0x1d7   : > { %p826_p6 = scmp.ne.s32.totalorder %s1089_s29, %s825_s19  ;;  %p830_p0 = scmp.lt.s32.totalorder %s1089_s29, %s1137_s6 }
 0x1d8   : > { %p831_p13 = scmp.lt.s32.totalorder %s829_s11, %s825_s19 }
 0x1d9   : > { %p827_p4 = pnand %p826_p6, %p1023_p12 }
 0x1da   : > { %p832_p8 = por %p831_p13, %p830_p0 }
 0x1db   : > { %p828_p9 = pneg %p827_p4 }
 0x1dd   : > { %p833_p1 = pnand %p832_p8, %p828_p9 }
 0x1df   : > { %836 = shalt.err (!%p833_p1)
}
 0x1e0   : > { %677 = dma.vmem_to_hbm [thread:$0]  (%p1023_p12), %s511_s14, 128, %s1089_s29, %s496_s7  }
 0x1e1 PF: > { %s522_s9 = sand.u32 1, %s875_s21   ;;  %p1150_p10 = scmp.ne.s32.totalorder %s1143_s8, 0 }
 0x1e2   : > { %p1151_p3 = scmp.ge.s32.totalorder %s895_s26, 2  ;;  %s523_s16 = scalar_lea.sflag [#allocation4], %s522_s9 }
 0x1e4   : > { %p688_p11 = pnand %p1151_p3, %p1150_p10 }
 0x1e6   : > { %p689_p2 = pneg %p688_p11 }
 0x1e8   : > { %870 = dma.done.wait (%p689_p2), %s523_s16, 128  }
 0x1e9   : > { %872 = vsyncadd (%p689_p2), %s523_s16, 4294967168  ;;  %s23_s26 = sadd.s32 1, %s895_s26   ;;  %s1152_s21 = smov %s879_s22 }
 0x1ea   : > { %p20_p5 = scmp.ge.s32.totalorder %s23_s26, 4   ;;  %s1153_s22 = smov %s883_s23 }
 0x1eb   : > { %s1154_s23 = smov %s1032_s10  ;;  %s1155_s24 = smov %s891_s25 }
 0x1ec   : > { %s1156_s25 = smov %s1158_s13  ;;  %22 = sbr.rel (!%p20_p5) target bundleno = 9 (0x9), region = 102 }
 0x1f1   :  { %528 = vsyncpa [#allocation3], 1 }
 0x1f2   :  { %530 = vsyncpa [#allocation3 + $0x1], 1 }
 0x1f3   :  { %531 = vsyncpa [#allocation6], 1 }
 0x1f4   :  { %532 = vsyncpa [#allocation4], 1 }
 0x1f5   :  { %534 = vsyncpa [#allocation4 + $0x1], 1 }

</bundles_post_ra>
